<compile_context>
chip_gen: v5e
topology: v5e:2x2
jax: 0.10.0
libtpu: 0.0.40
codegen_flags: <defaults>
</compile_context>

<pallas_src>
import jax
import jax.numpy as jnp
from jax.experimental import pallas as pl
from jax.experimental.pallas import tpu as pltpu


def _make_kernel(num_layers, hidden):
    """Build the fused kernel for a fixed (static) layer count / hidden size."""

    def kernel(*refs):
        # refs = (x, wp, bp, [wih, whh, bih, bhh] * L, out, h_scratch)
        x_ref, wp_ref, bp_ref = refs[:3]
        layer_refs = refs[3:3 + 4 * num_layers]
        out_ref = refs[3 + 4 * num_layers]
        h_scr = refs[3 + 4 * num_layers + 1]

        t = pl.program_id(1)
        H = hidden

        @pl.when(t == 0)
        def _init():
            h_scr[...] = jnp.zeros_like(h_scr)

        # Projection + LeakyReLU (negative_slope = 0.01, PyTorch default).
        x_t = x_ref[...]                                           # (TB, D_in)
        inp = jnp.dot(x_t, wp_ref[...],
                      preferred_element_type=jnp.float32) + bp_ref[...]
        inp = jnp.where(inp >= 0.0, inp, 0.01 * inp)               # (TB, P)

        # Stacked GRU cells, PyTorch gate order (r, z, n).
        for l in range(num_layers):
            wih_ref, whh_ref, bih_ref, bhh_ref = layer_refs[4 * l:4 * l + 4]
            h_prev = h_scr[l]                                      # (TB, H)
            gi = jnp.dot(inp, wih_ref[...],
                         preferred_element_type=jnp.float32) + bih_ref[...]
            gh = jnp.dot(h_prev, whh_ref[...],
                         preferred_element_type=jnp.float32) + bhh_ref[...]
            r = jax.nn.sigmoid(gi[:, 0:H] + gh[:, 0:H])
            z = jax.nn.sigmoid(gi[:, H:2 * H] + gh[:, H:2 * H])
            n = jnp.tanh(gi[:, 2 * H:3 * H] + r * gh[:, 2 * H:3 * H])
            h_new = (1.0 - z) * n + z * h_prev
            h_scr[l] = h_new
            inp = h_new                                            # feeds layer l+1

        # Emit the final hidden state of the LAST layer (== gru(x)[1][-1]).
        @pl.when(t == pl.num_programs(1) - 1)
        def _store():
            out_ref[...] = inp.astype(out_ref.dtype)

    return kernel


def feature_extractor(x, proj_w, proj_b, gru_params, *, batch_tile=None):
    """x: (B, T, D_in) f32 (batch_first, as in the PyTorch module).
    proj_w: (P, D_in), proj_b: (P,)  -- nn.Linear layout.
    gru_params: [(w_ih (3H, in_l), w_hh (3H, H), b_ih (3H,), b_hh (3H,))] * L.
    Returns the final hidden state of the last GRU layer, shape (B, H)."""
    B, T, D_in = x.shape
    P = proj_w.shape[0]
    H = gru_params[0][1].shape[1]
    num_layers = len(gru_params)

    # Batch tile: full batch for small B, otherwise multiple-of-8 chunks so the
    # VMEM footprint stays bounded (sized conservatively for v7x's 64 MiB).
    if batch_tile is None:
        batch_tile = B if B <= 1024 else 1024
    assert B % batch_tile == 0
    assert batch_tile == B or batch_tile % 8 == 0
    nb = B // batch_tile

    # Glue: time-major input, (in, out)-transposed weights, 2-D row biases.
    x_tm = jnp.transpose(x, (1, 0, 2))                  # (T, B, D_in)
    wp_t = proj_w.T                                     # (D_in, P)
    bp_2d = proj_b.reshape(1, P)

    flat_params = []
    in_specs = [
        # One timestep block per grid step; leading (time) dim squeezed.
        pl.BlockSpec((None, batch_tile, D_in), lambda i, t: (t, i, 0)),
        # Weights / biases: constant block index -> stay VMEM-resident.
        pl.BlockSpec((D_in, P), lambda i, t: (0, 0)),
        pl.BlockSpec((1, P), lambda i, t: (0, 0)),
    ]
    for (w_ih, w_hh, b_ih, b_hh) in gru_params:
        in_l = w_ih.shape[1]
        flat_params += [w_ih.T, w_hh.T,
                        b_ih.reshape(1, 3 * H), b_hh.reshape(1, 3 * H)]
        in_specs += [
            pl.BlockSpec((in_l, 3 * H), lambda i, t: (0, 0)),
            pl.BlockSpec((H, 3 * H), lambda i, t: (0, 0)),
            pl.BlockSpec((1, 3 * H), lambda i, t: (0, 0)),
            pl.BlockSpec((1, 3 * H), lambda i, t: (0, 0)),
        ]

    kernel = _make_kernel(num_layers, H)

    out = pl.pallas_call(
        kernel,
        out_shape=jax.ShapeDtypeStruct((B, H), jnp.float32),
        grid=(nb, T),
        in_specs=in_specs,
        out_specs=pl.BlockSpec((batch_tile, H), lambda i, t: (i, 0)),
        scratch_shapes=[pltpu.VMEM((num_layers, batch_tile, H), jnp.float32)],
        compiler_params=pltpu.CompilerParams(
            dimension_semantics=("parallel", "arbitrary")),
    )(x_tm, wp_t, bp_2d, *flat_params)
    return out


def _ref(x, proj_w, proj_b, gru_params):
    """Pure-JAX reference mirroring the PyTorch forward."""
    h = x @ proj_w.T + proj_b
    h = jnp.where(h >= 0.0, h, 0.01 * h)
    B, T, _ = x.shape
    layer_in = h
    ht = None
    for (w_ih, w_hh, b_ih, b_hh) in gru_params:
        H = w_hh.shape[1]
        ht = jnp.zeros((B, H), jnp.float32)
        outs = []
        for t in range(T):
            gi = layer_in[:, t, :] @ w_ih.T + b_ih
            gh = ht @ w_hh.T + b_hh
            r = jax.nn.sigmoid(gi[:, :H] + gh[:, :H])
            z = jax.nn.sigmoid(gi[:, H:2 * H] + gh[:, H:2 * H])
            n = jnp.tanh(gi[:, 2 * H:] + r * gh[:, 2 * H:])
            ht = (1.0 - z) * n + z * ht
            outs.append(ht)
        layer_in = jnp.stack(outs, axis=1)
    return ht


if __name__ == "__main__":
    # Small shapes consistent with the module:
    # batch=2, seq=8, input_dim=16, proj_dim=32, embedding_dim=32, num_layers=2.
    B, T, D_in, P, H, L = 2, 8, 16, 32, 32, 2

    key = jax.random.PRNGKey(0)
    keys = jax.random.split(key, 3 + 4 * L)

    x = jax.random.normal(keys[0], (B, T, D_in), dtype=jnp.float32)
    proj_w = jax.random.normal(keys[1], (P, D_in), dtype=jnp.float32) * 0.1
    proj_b = jax.random.normal(keys[2], (P,), dtype=jnp.float32) * 0.1

    gru_params = []
    for l in range(L):
        in_l = P if l == 0 else H
        k0, k1, k2, k3 = keys[3 + 4 * l: 3 + 4 * l + 4]
        gru_params.append((
            jax.random.normal(k0, (3 * H, in_l), dtype=jnp.float32) * 0.1,
            jax.random.normal(k1, (3 * H, H), dtype=jnp.float32) * 0.1,
            jax.random.normal(k2, (3 * H,), dtype=jnp.float32) * 0.1,
            jax.random.normal(k3, (3 * H,), dtype=jnp.float32) * 0.1,
        ))

    out = feature_extractor(x, proj_w, proj_b, gru_params)
    jax.block_until_ready(out)

    ref = _ref(x, proj_w, proj_b, gru_params)
    assert out.shape == (B, H)
    assert jnp.allclose(out, ref, atol=1e-4, rtol=1e-4), \
        float(jnp.max(jnp.abs(out - ref)))

    print("KERNEL_OK")
</pallas_src>

<mosaic_0001>
module attributes {stable_mosaic.version = 11 : i64} {
  func.func @kernel(%arg0: i32, %arg1: i32, %arg2: memref<1x2x16xf32, #tpu.memory_space<vmem>>, %arg3: memref<16x32xf32, #tpu.memory_space<vmem>>, %arg4: memref<1x32xf32, #tpu.memory_space<vmem>>, %arg5: memref<32x96xf32, #tpu.memory_space<vmem>>, %arg6: memref<32x96xf32, #tpu.memory_space<vmem>>, %arg7: memref<1x96xf32, #tpu.memory_space<vmem>>, %arg8: memref<1x96xf32, #tpu.memory_space<vmem>>, %arg9: memref<32x96xf32, #tpu.memory_space<vmem>>, %arg10: memref<32x96xf32, #tpu.memory_space<vmem>>, %arg11: memref<1x96xf32, #tpu.memory_space<vmem>>, %arg12: memref<1x96xf32, #tpu.memory_space<vmem>>, %arg13: memref<2x32xf32, #tpu.memory_space<vmem>>, %arg14: memref<2x2x32xf32, #tpu.memory_space<vmem>>) attributes {dimension_semantics = [#tpu.dimension_semantics<parallel>, #tpu.dimension_semantics<arbitrary>], iteration_bounds = array<i64: 1, 8>, scalar_prefetch = 0 : i64, scratch_operands = 1 : i64, tpu.core_type = #tpu.core_type<tc>, window_params = [{transform_indices = @transform_0, window_bounds = array<i64: 1, 2, 16>}, {pipeline_mode = #tpu.pipeline_mode<synchronous>, transform_indices = @transform_1, window_bounds = array<i64: 16, 32>}, {pipeline_mode = #tpu.pipeline_mode<synchronous>, transform_indices = @transform_2, window_bounds = array<i64: 1, 32>}, {pipeline_mode = #tpu.pipeline_mode<synchronous>, transform_indices = @transform_3, window_bounds = array<i64: 32, 96>}, {pipeline_mode = #tpu.pipeline_mode<synchronous>, transform_indices = @transform_4, window_bounds = array<i64: 32, 96>}, {pipeline_mode = #tpu.pipeline_mode<synchronous>, transform_indices = @transform_5, window_bounds = array<i64: 1, 96>}, {pipeline_mode = #tpu.pipeline_mode<synchronous>, transform_indices = @transform_6, window_bounds = array<i64: 1, 96>}, {pipeline_mode = #tpu.pipeline_mode<synchronous>, transform_indices = @transform_7, window_bounds = array<i64: 32, 96>}, {pipeline_mode = #tpu.pipeline_mode<synchronous>, transform_indices = @transform_8, window_bounds = array<i64: 32, 96>}, {pipeline_mode = #tpu.pipeline_mode<synchronous>, transform_indices = @transform_9, window_bounds = array<i64: 1, 96>}, {pipeline_mode = #tpu.pipeline_mode<synchronous>, transform_indices = @transform_10, window_bounds = array<i64: 1, 96>}, {transform_indices = @transform_11, window_bounds = array<i64: 2, 32>}]} {
    %c0_i32 = arith.constant 0 : i32
    %0 = arith.cmpi eq, %arg1, %c0_i32 : i32
    %1 = arith.extui %0 : i1 to i32
    %c0_i32_0 = arith.constant 0 : i32
    %2 = arith.cmpi ne, %1, %c0_i32_0 : i32
    scf.if %2 {
      %cst_47 = arith.constant 0.000000e+00 : f32
      %100 = vector.broadcast %cst_47 : f32 to vector<2x2x32xf32>
      %c0_48 = arith.constant 0 : index
      %c0_49 = arith.constant 0 : index
      %c0_50 = arith.constant 0 : index
      %101 = vector.load %arg14[%c0_48, %c0_49, %c0_50] : memref<2x2x32xf32, #tpu.memory_space<vmem>>, vector<2x2x32xf32>
      tpu.vector_store %arg14[%c0_48, %c0_49, %c0_50], %100 {strides = array<i32>} : memref<2x2x32xf32, #tpu.memory_space<vmem>>, vector<2x2x32xf32>,
    } else {
    }
    %c0 = arith.constant 0 : index
    %c0_1 = arith.constant 0 : index
    %c0_2 = arith.constant 0 : index
    %3 = vector.load %arg2[%c0, %c0_1, %c0_2] : memref<1x2x16xf32, #tpu.memory_space<vmem>>, vector<1x2x16xf32>
    %4 = vector.shape_cast %3 : vector<1x2x16xf32> to vector<2x16xf32>
    %c0_3 = arith.constant 0 : index
    %c0_4 = arith.constant 0 : index
    %5 = vector.load %arg3[%c0_3, %c0_4] : memref<16x32xf32, #tpu.memory_space<vmem>>, vector<16x32xf32>
    %cst = arith.constant dense<0.000000e+00> : vector<2x32xf32>
    %6 = tpu.matmul %4, %5, %cst {dimension_numbers = #tpu.dot_dimension_numbers<[1], [0], [0], [1], [0, 0, 1, 1], [], []>} : vector<2x16xf32>, vector<16x32xf32>, vector<2x32xf32> -> vector<2x32xf32>
    %c0_5 = arith.constant 0 : index
    %c0_6 = arith.constant 0 : index
    %7 = vector.load %arg4[%c0_5, %c0_6] : memref<1x32xf32, #tpu.memory_space<vmem>>, vector<1x32xf32>
    %8 = vector.broadcast %7 : vector<1x32xf32> to vector<2x32xf32>
    %9 = arith.addf %6, %8 : vector<2x32xf32>
    %cst_7 = arith.constant 0.000000e+00 : f32
    %10 = vector.broadcast %cst_7 : f32 to vector<2x32xf32>
    %11 = arith.cmpf oge, %9, %10 : vector<2x32xf32>
    %cst_8 = arith.constant 0.00999999977 : f32
    %12 = vector.broadcast %cst_8 : f32 to vector<2x32xf32>
    %13 = arith.mulf %12, %9 : vector<2x32xf32>
    %14 = arith.select %11, %9, %13 : vector<2x32xi1>, vector<2x32xf32>
    %c0_9 = arith.constant 0 : index
    %c0_10 = arith.constant 0 : index
    %c0_11 = arith.constant 0 : index
    %15 = vector.load %arg14[%c0_9, %c0_10, %c0_11] : memref<2x2x32xf32, #tpu.memory_space<vmem>>, vector<1x2x32xf32>
    %16 = vector.shape_cast %15 : vector<1x2x32xf32> to vector<2x32xf32>
    %c0_12 = arith.constant 0 : index
    %c0_13 = arith.constant 0 : index
    %17 = vector.load %arg5[%c0_12, %c0_13] : memref<32x96xf32, #tpu.memory_space<vmem>>, vector<32x96xf32>
    %cst_14 = arith.constant dense<0.000000e+00> : vector<2x96xf32>
    %18 = tpu.matmul %14, %17, %cst_14 {dimension_numbers = #tpu.dot_dimension_numbers<[1], [0], [0], [1], [0, 0, 1, 1], [], []>} : vector<2x32xf32>, vector<32x96xf32>, vector<2x96xf32> -> vector<2x96xf32>
    %c0_15 = arith.constant 0 : index
    %c0_16 = arith.constant 0 : index
    %19 = vector.load %arg7[%c0_15, %c0_16] : memref<1x96xf32, #tpu.memory_space<vmem>>, vector<1x96xf32>
    %20 = vector.broadcast %19 : vector<1x96xf32> to vector<2x96xf32>
    %21 = arith.addf %18, %20 : vector<2x96xf32>
    %c0_17 = arith.constant 0 : index
    %c0_18 = arith.constant 0 : index
    %22 = vector.load %arg6[%c0_17, %c0_18] : memref<32x96xf32, #tpu.memory_space<vmem>>, vector<32x96xf32>
    %cst_19 = arith.constant dense<0.000000e+00> : vector<2x96xf32>
    %23 = tpu.matmul %16, %22, %cst_19 {dimension_numbers = #tpu.dot_dimension_numbers<[1], [0], [0], [1], [0, 0, 1, 1], [], []>} : vector<2x32xf32>, vector<32x96xf32>, vector<2x96xf32> -> vector<2x96xf32>
    %c0_20 = arith.constant 0 : index
    %c0_21 = arith.constant 0 : index
    %24 = vector.load %arg8[%c0_20, %c0_21] : memref<1x96xf32, #tpu.memory_space<vmem>>, vector<1x96xf32>
    %25 = vector.broadcast %24 : vector<1x96xf32> to vector<2x96xf32>
    %26 = arith.addf %23, %25 : vector<2x96xf32>
    %27 = vector.extract_strided_slice %21 {offsets = [0, 0], sizes = [2, 32], strides = [1, 1]} : vector<2x96xf32> to vector<2x32xf32>
    %28 = vector.extract_strided_slice %26 {offsets = [0, 0], sizes = [2, 32], strides = [1, 1]} : vector<2x96xf32> to vector<2x32xf32>
    %29 = arith.addf %27, %28 : vector<2x32xf32>
    %30 = arith.negf %29 : vector<2x32xf32>
    %31 = math.exp %30 : vector<2x32xf32>
    %cst_22 = arith.constant 1.000000e+00 : f32
    %32 = vector.broadcast %cst_22 : f32 to vector<2x32xf32>
    %33 = arith.addf %32, %31 : vector<2x32xf32>
    %34 = arith.divf %32, %33 : vector<2x32xf32>
    %35 = vector.extract_strided_slice %21 {offsets = [0, 32], sizes = [2, 32], strides = [1, 1]} : vector<2x96xf32> to vector<2x32xf32>
    %36 = vector.extract_strided_slice %26 {offsets = [0, 32], sizes = [2, 32], strides = [1, 1]} : vector<2x96xf32> to vector<2x32xf32>
    %37 = arith.addf %35, %36 : vector<2x32xf32>
    %38 = arith.negf %37 : vector<2x32xf32>
    %39 = math.exp %38 : vector<2x32xf32>
    %cst_23 = arith.constant 1.000000e+00 : f32
    %40 = vector.broadcast %cst_23 : f32 to vector<2x32xf32>
    %41 = arith.addf %40, %39 : vector<2x32xf32>
    %42 = arith.divf %40, %41 : vector<2x32xf32>
    %43 = vector.extract_strided_slice %21 {offsets = [0, 64], sizes = [2, 32], strides = [1, 1]} : vector<2x96xf32> to vector<2x32xf32>
    %44 = vector.extract_strided_slice %26 {offsets = [0, 64], sizes = [2, 32], strides = [1, 1]} : vector<2x96xf32> to vector<2x32xf32>
    %45 = arith.mulf %34, %44 : vector<2x32xf32>
    %46 = arith.addf %43, %45 : vector<2x32xf32>
    %47 = math.tanh %46 : vector<2x32xf32>
    %cst_24 = arith.constant 1.000000e+00 : f32
    %48 = vector.broadcast %cst_24 : f32 to vector<2x32xf32>
    %49 = arith.subf %48, %42 : vector<2x32xf32>
    %50 = arith.mulf %49, %47 : vector<2x32xf32>
    %51 = arith.mulf %42, %16 : vector<2x32xf32>
    %52 = arith.addf %50, %51 : vector<2x32xf32>
    %c0_25 = arith.constant 0 : index
    %c0_26 = arith.constant 0 : index
    %c0_27 = arith.constant 0 : index
    %53 = vector.load %arg14[%c0_25, %c0_26, %c0_27] : memref<2x2x32xf32, #tpu.memory_space<vmem>>, vector<1x2x32xf32>
    %54 = vector.shape_cast %53 : vector<1x2x32xf32> to vector<2x32xf32>
    %55 = vector.shape_cast %52 : vector<2x32xf32> to vector<1x2x32xf32>
    tpu.vector_store %arg14[%c0_25, %c0_26, %c0_27], %55 {strides = array<i32>} : memref<2x2x32xf32, #tpu.memory_space<vmem>>, vector<1x2x32xf32>,
    %c1 = arith.constant 1 : index
    %c0_28 = arith.constant 0 : index
    %c0_29 = arith.constant 0 : index
    %56 = vector.load %arg14[%c1, %c0_28, %c0_29] : memref<2x2x32xf32, #tpu.memory_space<vmem>>, vector<1x2x32xf32>
    %57 = vector.shape_cast %56 : vector<1x2x32xf32> to vector<2x32xf32>
    %c0_30 = arith.constant 0 : index
    %c0_31 = arith.constant 0 : index
    %58 = vector.load %arg9[%c0_30, %c0_31] : memref<32x96xf32, #tpu.memory_space<vmem>>, vector<32x96xf32>
    %cst_32 = arith.constant dense<0.000000e+00> : vector<2x96xf32>
    %59 = tpu.matmul %52, %58, %cst_32 {dimension_numbers = #tpu.dot_dimension_numbers<[1], [0], [0], [1], [0, 0, 1, 1], [], []>} : vector<2x32xf32>, vector<32x96xf32>, vector<2x96xf32> -> vector<2x96xf32>
    %c0_33 = arith.constant 0 : index
    %c0_34 = arith.constant 0 : index
    %60 = vector.load %arg11[%c0_33, %c0_34] : memref<1x96xf32, #tpu.memory_space<vmem>>, vector<1x96xf32>
    %61 = vector.broadcast %60 : vector<1x96xf32> to vector<2x96xf32>
    %62 = arith.addf %59, %61 : vector<2x96xf32>
    %c0_35 = arith.constant 0 : index
    %c0_36 = arith.constant 0 : index
    %63 = vector.load %arg10[%c0_35, %c0_36] : memref<32x96xf32, #tpu.memory_space<vmem>>, vector<32x96xf32>
    %cst_37 = arith.constant dense<0.000000e+00> : vector<2x96xf32>
    %64 = tpu.matmul %57, %63, %cst_37 {dimension_numbers = #tpu.dot_dimension_numbers<[1], [0], [0], [1], [0, 0, 1, 1], [], []>} : vector<2x32xf32>, vector<32x96xf32>, vector<2x96xf32> -> vector<2x96xf32>
    %c0_38 = arith.constant 0 : index
    %c0_39 = arith.constant 0 : index
    %65 = vector.load %arg12[%c0_38, %c0_39] : memref<1x96xf32, #tpu.memory_space<vmem>>, vector<1x96xf32>
    %66 = vector.broadcast %65 : vector<1x96xf32> to vector<2x96xf32>
    %67 = arith.addf %64, %66 : vector<2x96xf32>
    %68 = vector.extract_strided_slice %62 {offsets = [0, 0], sizes = [2, 32], strides = [1, 1]} : vector<2x96xf32> to vector<2x32xf32>
    %69 = vector.extract_strided_slice %67 {offsets = [0, 0], sizes = [2, 32], strides = [1, 1]} : vector<2x96xf32> to vector<2x32xf32>
    %70 = arith.addf %68, %69 : vector<2x32xf32>
    %71 = arith.negf %70 : vector<2x32xf32>
    %72 = math.exp %71 : vector<2x32xf32>
    %cst_40 = arith.constant 1.000000e+00 : f32
    %73 = vector.broadcast %cst_40 : f32 to vector<2x32xf32>
    %74 = arith.addf %73, %72 : vector<2x32xf32>
    %75 = arith.divf %73, %74 : vector<2x32xf32>
    %76 = vector.extract_strided_slice %62 {offsets = [0, 32], sizes = [2, 32], strides = [1, 1]} : vector<2x96xf32> to vector<2x32xf32>
    %77 = vector.extract_strided_slice %67 {offsets = [0, 32], sizes = [2, 32], strides = [1, 1]} : vector<2x96xf32> to vector<2x32xf32>
    %78 = arith.addf %76, %77 : vector<2x32xf32>
    %79 = arith.negf %78 : vector<2x32xf32>
    %80 = math.exp %79 : vector<2x32xf32>
    %cst_41 = arith.constant 1.000000e+00 : f32
    %81 = vector.broadcast %cst_41 : f32 to vector<2x32xf32>
    %82 = arith.addf %81, %80 : vector<2x32xf32>
    %83 = arith.divf %81, %82 : vector<2x32xf32>
    %84 = vector.extract_strided_slice %62 {offsets = [0, 64], sizes = [2, 32], strides = [1, 1]} : vector<2x96xf32> to vector<2x32xf32>
    %85 = vector.extract_strided_slice %67 {offsets = [0, 64], sizes = [2, 32], strides = [1, 1]} : vector<2x96xf32> to vector<2x32xf32>
    %86 = arith.mulf %75, %85 : vector<2x32xf32>
    %87 = arith.addf %84, %86 : vector<2x32xf32>
    %88 = math.tanh %87 : vector<2x32xf32>
    %cst_42 = arith.constant 1.000000e+00 : f32
    %89 = vector.broadcast %cst_42 : f32 to vector<2x32xf32>
    %90 = arith.subf %89, %83 : vector<2x32xf32>
    %91 = arith.mulf %90, %88 : vector<2x32xf32>
    %92 = arith.mulf %83, %57 : vector<2x32xf32>
    %93 = arith.addf %91, %92 : vector<2x32xf32>
    %c1_43 = arith.constant 1 : index
    %c0_44 = arith.constant 0 : index
    %c0_45 = arith.constant 0 : index
    %94 = vector.load %arg14[%c1_43, %c0_44, %c0_45] : memref<2x2x32xf32, #tpu.memory_space<vmem>>, vector<1x2x32xf32>
    %95 = vector.shape_cast %94 : vector<1x2x32xf32> to vector<2x32xf32>
    %96 = vector.shape_cast %93 : vector<2x32xf32> to vector<1x2x32xf32>
    tpu.vector_store %arg14[%c1_43, %c0_44, %c0_45], %96 {strides = array<i32>} : memref<2x2x32xf32, #tpu.memory_space<vmem>>, vector<1x2x32xf32>,
    %c7_i32 = arith.constant 7 : i32
    %97 = arith.cmpi eq, %arg1, %c7_i32 : i32
    %98 = arith.extui %97 : i1 to i32
    %c0_i32_46 = arith.constant 0 : i32
    %99 = arith.cmpi ne, %98, %c0_i32_46 : i32
    scf.if %99 {
      %c0_47 = arith.constant 0 : index
      %c0_48 = arith.constant 0 : index
      %100 = vector.load %arg13[%c0_47, %c0_48] : memref<2x32xf32, #tpu.memory_space<vmem>>, vector<2x32xf32>
      tpu.vector_store %arg13[%c0_47, %c0_48], %93 {strides = array<i32>} : memref<2x32xf32, #tpu.memory_space<vmem>>, vector<2x32xf32>,
    } else {
    }
    return
  }
  func.func @transform_0(%arg0: i32, %arg1: i32) -> (i32, i32, i32) {
    %c0_i32 = arith.constant 0 : i32
    %c0_i32_0 = arith.constant 0 : i32
    return %arg1, %arg0, %c0_i32 : i32, i32, i32
  }
  func.func @transform_1(%arg0: i32, %arg1: i32) -> (i32, i32) {
    %c0_i32 = arith.constant 0 : i32
    %c0_i32_0 = arith.constant 0 : i32
    %c0_i32_1 = arith.constant 0 : i32
    return %c0_i32, %c0_i32_0 : i32, i32
  }
  func.func @transform_2(%arg0: i32, %arg1: i32) -> (i32, i32) {
    %c0_i32 = arith.constant 0 : i32
    %c0_i32_0 = arith.constant 0 : i32
    %c0_i32_1 = arith.constant 0 : i32
    return %c0_i32, %c0_i32_0 : i32, i32
  }
  func.func @transform_3(%arg0: i32, %arg1: i32) -> (i32, i32) {
    %c0_i32 = arith.constant 0 : i32
    %c0_i32_0 = arith.constant 0 : i32
    %c0_i32_1 = arith.constant 0 : i32
    return %c0_i32, %c0_i32_0 : i32, i32
  }
  func.func @transform_4(%arg0: i32, %arg1: i32) -> (i32, i32) {
    %c0_i32 = arith.constant 0 : i32
    %c0_i32_0 = arith.constant 0 : i32
    %c0_i32_1 = arith.constant 0 : i32
    return %c0_i32, %c0_i32_0 : i32, i32
  }
  func.func @transform_5(%arg0: i32, %arg1: i32) -> (i32, i32) {
    %c0_i32 = arith.constant 0 : i32
    %c0_i32_0 = arith.constant 0 : i32
    %c0_i32_1 = arith.constant 0 : i32
    return %c0_i32, %c0_i32_0 : i32, i32
  }
  func.func @transform_6(%arg0: i32, %arg1: i32) -> (i32, i32) {
    %c0_i32 = arith.constant 0 : i32
    %c0_i32_0 = arith.constant 0 : i32
    %c0_i32_1 = arith.constant 0 : i32
    return %c0_i32, %c0_i32_0 : i32, i32
  }
  func.func @transform_7(%arg0: i32, %arg1: i32) -> (i32, i32) {
    %c0_i32 = arith.constant 0 : i32
    %c0_i32_0 = arith.constant 0 : i32
    %c0_i32_1 = arith.constant 0 : i32
    return %c0_i32, %c0_i32_0 : i32, i32
  }
  func.func @transform_8(%arg0: i32, %arg1: i32) -> (i32, i32) {
    %c0_i32 = arith.constant 0 : i32
    %c0_i32_0 = arith.constant 0 : i32
    %c0_i32_1 = arith.constant 0 : i32
    return %c0_i32, %c0_i32_0 : i32, i32
  }
  func.func @transform_9(%arg0: i32, %arg1: i32) -> (i32, i32) {
    %c0_i32 = arith.constant 0 : i32
    %c0_i32_0 = arith.constant 0 : i32
    %c0_i32_1 = arith.constant 0 : i32
    return %c0_i32, %c0_i32_0 : i32, i32
  }
  func.func @transform_10(%arg0: i32, %arg1: i32) -> (i32, i32) {
    %c0_i32 = arith.constant 0 : i32
    %c0_i32_0 = arith.constant 0 : i32
    %c0_i32_1 = arith.constant 0 : i32
    return %c0_i32, %c0_i32_0 : i32, i32
  }
  func.func @transform_11(%arg0: i32, %arg1: i32) -> (i32, i32) {
    %c0_i32 = arith.constant 0 : i32
    %c0_i32_0 = arith.constant 0 : i32
    return %arg0, %c0_i32 : i32, i32
  }
}

</mosaic_0001>

<bundles_post_ra>
// kernel: tpu_custom_call.1
= control target key start
LH: loop header
LB: loop body
LE: loop exit
PB: predicated region body
PF: predicated region fallthrough
CT: control target
= control target key end

     0   :  { %s1582_s0 = inlined_call_operand.hbm [shape: f32[8,2,16], index: 0, kind: input, shape index: {}]   ;;  %s1583_s1 = inlined_call_operand.hbm [shape: f32[16,32], index: 1, kind: input, shape index: {}]   ;;  %s1584_s2 = inlined_call_operand.vmem [shape: f32[1,32], index: 2, kind: input, shape index: {}]   ;;  %s1585_s3 = inlined_call_operand.hbm [shape: f32[32,96], index: 3, kind: input, shape index: {}]   ;;  %s1586_s4 = inlined_call_operand.hbm [shape: f32[32,96], index: 4, kind: input, shape index: {}]   ;;  %s1587_s5 = inlined_call_operand.vmem [shape: f32[1,96], index: 5, kind: input, shape index: {}]   ;;  %s1588_s6 = inlined_call_operand.vmem [shape: f32[1,96], index: 6, kind: input, shape index: {}]   ;;  %s1589_s7 = inlined_call_operand.hbm [shape: f32[32,96], index: 7, kind: input, shape index: {}]   ;;  %s1590_s8 = inlined_call_operand.hbm [shape: f32[32,96], index: 8, kind: input, shape index: {}]   ;;  %s1591_s9 = inlined_call_operand.vmem [shape: f32[1,96], index: 9, kind: input, shape index: {}]   ;;  %s1592_s10 = inlined_call_operand.vmem [shape: f32[1,96], index: 10, kind: input, shape index: {}]   ;;  %s1593_s11 = inlined_call_operand.hbm [shape: f32[2,32], index: 11, kind: output, shape index: {}]  }
   0x1   :  { %1595 = sst [smem:[#allocation20_spill]] %s1583_s1 }
   0x2   :  { %1596 = sst [smem:[#allocation21_spill]] %s1585_s3 }
   0x3   :  { %1597 = sst [smem:[#allocation22_spill]] %s1586_s4 }
   0x4   :  { %1598 = sst [smem:[#allocation23_spill]] %s1591_s9 }
   0x5   :  { %1599 = sst [smem:[#allocation24_spill]] %s1592_s10 }
   0x6   :  { %1600 = sst [smem:[#allocation25_spill]] %s1593_s11 }
   0x7   :  { %16 = vsyncpa [#allocation4], 0 }
   0x8   :  { %18 = vsyncpa [#allocation4 + $0x1], 0 }
   0x9   :  { %19 = vsyncpa [#allocation7], 0 }
   0xa   :  { %20 = vsyncpa [#allocation10], 0 }
   0xb   :  { %21 = vsyncpa [#allocation13], 0 }
   0xc   :  { %22 = vsyncpa [#allocation5], 0  ;;  %s1398_s17 = smov 0   ;;  %s1400_s18 = smov 0  }
   0xd   :  { %s1402_s19 = smov 0   ;;  %s1404_s20 = smov 0  }
   0xe   :  { %s1406_s21 = smov 0   ;;  %s1408_s22 = smov 0  }
   0xf LB: > { %s1594_s23 = sadd.s32 4294967295, %s1324_s22   ;;  %p885_p0 = scmp.ge.s32.totalorder %s1324_s22, 1  ;;  %s1324_s22 = sphi %s1408_s22, %s28_s22   ;;  %s1320_s21 = sphi %s1406_s21, %s1617_s21   ;;  %s1316_s20 = sphi %s1404_s20, %s1616_s20   ;;  %s1312_s19 = sphi %s1402_s19, %s1615_s19   ;;  %s1308_s18 = sphi %s1400_s18, %s1614_s18   ;;  %s1304_s17 = sphi %s1398_s17, %s1613_s17  }
  0x10   : > { %p1432_p1 = scmp.eq.s32.totalorder %s1594_s23, 0  ;;  %p309_p2 = scmp.lt.s32.totalorder %s1324_s22, 9 }
  0x11   : > { %s1602_s1 = sld [smem:[#allocation20_spill]]  ;;  %s1326_s29 = smov [#allocation6]  }
  0x12   : > { %p1440_p3 = pnand %p885_p0, %p309_p2  ;;  %s322_s30 = sshll.u32 %s1326_s29, 4  ;;  %s323_s30 = int_to_ptr.vmem [resolvable:$true] %s322_s30 }
  0x13   : > { %s1605_s4 = sld [smem:[#allocation22_spill]]  ;;  %s1327_s16 = smov 128  }
  0x14   : > { %p940_p4 = pneg %p1440_p3  ;;  %s1328_s25 = smov 8  }
  0x15   : > { %s1329_s26 = smov [#allocation9]   ;;  %s1606_s3 = sld [smem:[#allocation21_spill]] }
  0x16   : > { %p1448_p5 = pnand %p940_p4, %p1432_p1  ;;  %s353_s29 = sshll.u32 %s1329_s26, 4  ;;  %s354_s29 = int_to_ptr.vmem [resolvable:$true] %s353_s29 }
  0x17   : > { %s320_s27 = sshll.u32 %s1602_s1, 4  ;;  %s1330_s9 = smov [#allocation8]   ;;  %s321_s27 = int_to_ptr.hbm [resolvable:$true] %s320_s27 }
  0x18   : > { %943 = dma.hbm_to_vmem [thread:$0]  (!%p1448_p5), %s321_s27, 256, %s323_s30, [#allocation7], %s1327_s16, %s1327_s16, %s1328_s25  }
  0x19   : > { %s351_s15 = sshll.u32 %s1605_s4, 4  ;;  %s371_s4 = sshll.u32 %s1589_s7, 4  ;;  %s352_s15 = int_to_ptr.hbm [resolvable:$true] %s351_s15  ;;  %s372_s4 = int_to_ptr.hbm [resolvable:$true] %s371_s4 }
  0x1a   : > { %949 = dma.hbm_to_vmem [thread:$0]  (!%p1448_p5), %s352_s15, 512, %s354_s29, [#allocation10], %s1327_s16, %s1327_s16, %s1328_s25  }
  0x1b   : > { %s337_s11 = sshll.u32 %s1606_s3, 4  ;;  %s339_s10 = sshll.u32 %s1330_s9, 4  ;;  %s338_s11 = int_to_ptr.hbm [resolvable:$true] %s337_s11  ;;  %s340_s10 = int_to_ptr.vmem [resolvable:$true] %s339_s10 }
  0x1c   : > { %946 = dma.hbm_to_vmem [thread:$0]  (!%p1448_p5), %s338_s11, 512, %s340_s10, [#allocation7], %s1327_s16, %s1327_s16, %s1328_s25  }
  0x1d   : > { %s1331_s1 = smov [#allocation11]   ;;  %s385_s15 = sshll.u32 %s1590_s8, 4  ;;  %s386_s15 = int_to_ptr.hbm [resolvable:$true] %s385_s15 }
  0x1e   : > { %s373_s23 = sshll.u32 %s1331_s1, 4  ;;  %s1332_s9 = smov [#allocation12]   ;;  %s374_s23 = int_to_ptr.vmem [resolvable:$true] %s373_s23 }
  0x1f   : > { %952 = dma.hbm_to_vmem [thread:$0]  (!%p1448_p5), %s372_s4, 512, %s374_s23, [#allocation10], %s1327_s16, %s1327_s16, %s1328_s25  }
  0x20   : > { %s387_s26 = sshll.u32 %s1332_s9, 4  ;;  %s37_s10 = sadd.s32 1, %s1320_s21  ;;  %s388_s26 = int_to_ptr.vmem [resolvable:$true] %s387_s26 }
  0x21   : > { %955 = dma.hbm_to_vmem [thread:$0]  (!%p1448_p5), %s386_s15, 512, %s388_s26, [#allocation13], %s1327_s16, %s1327_s16, %s1328_s25  }
  0x22   : > { %p38_p6 = scmp.ge.s32.totalorder %s37_s10, 8  ;;  %p56_p7 = scmp.ne.s32.totalorder %s1312_s19, %s1308_s18 }
  0x23   : > { %p57_p8 = scmp.eq.s32.totalorder %s1324_s22, 0  ;;  %s49_s11 = sadd.s32 1, %s1312_s19 }
  0x24   : > { %s1619_s10 = smov (%p38_p6, %s37_s10), 0  ;;  %p62_p9 = scmp.ne.s32.totalorder %s1308_s18, %s1304_s17 }
  0x25   : > { %s44_s29 = ssub.s32 %s1320_s21, %s1619_s10  ;;  %p1485_p10 = por %p57_p8, %p56_p7 }
  0x26   : > { %p47_p11 = scmp.eq.s32.totalorder %s44_s29, 0  ;;  %p1491_p12 = por %p1432_p1, %p62_p9 }
  0x27   : > { %s407_s16 = sand.u32 1, %s1312_s19   ;;  %s893_s25 = sshll.u32 %s1320_s21, 1 }
  0x28   : > { %s1498_s13 = scalar_select %p47_p11, %s1312_s19, %s49_s11  }
  0x29   : > { %p965_p13 = scmp.lt.s32.totalorder %s1324_s22, 8  ;;  %s892_s14 = sshll.u32 %s407_s16, 1 }
  0x2a   : > { %s416_s23 = scalar_lea.hbm %s1582_s0, %s893_s25  ;;  %s411_s30 = scalar_lea.vmem [#allocation3], %s892_s14 }
  0x2b   : > { %s418_s27 = sshll.u32 %s416_s23, 4  ;;  %s420_s15 = sshll.u32 %s411_s30, 4  ;;  %s419_s27 = int_to_ptr.hbm [resolvable:$true] %s418_s27  ;;  %s421_s15 = int_to_ptr.vmem [resolvable:$true] %s420_s15 }
  0x2c   : > { %p957_p0 = pnand %p965_p13, %p1485_p10  ;;  %s408_s9 = scalar_lea.sflag [#allocation4], %s407_s16 }
  0x2d   : > { %429 = sbr.rel (%p1440_p3) target bundleno = 1240 (0x4d8), region = 64  ;;  %s431_s26 = sand.u32 (!%p1440_p3), 1, %s1308_s18  }
  0x2e   : > { %959 = dma.hbm_to_vmem [thread:$0]  (!%p957_p0), %s419_s27, 32, %s421_s15, %s408_s9  }
  0x2f   : > { %s895_s11 = sshll.u32 (!%p1440_p3), %s431_s26, 1  ;;  %s432_s29 = scalar_lea.sflag (!%p1440_p3), [#allocation4], %s431_s26 }
  0x30   : > { %s435_s3 = scalar_lea.vmem (!%p1440_p3), [#allocation3], %s895_s11 }
  0x32   : > { %1283 = dma.done.wait (%p1491_p12), %s432_s29, 32  }
  0x33   : > { %1285 = vsyncadd (%p1491_p12), %s432_s29, 4294967264 }
  0x34   : > { %1287 = dma.done.wait (%p1432_p1), [#allocation7], 768  }
  0x35   : > { %1289 = vsyncadd (%p1432_p1), [#allocation7], 4294966528 }
  0x36   : > { %1291 = dma.done.wait (%p1432_p1), [#allocation10], 1024  }
  0x37   : > { %1293 = vsyncadd (%p1432_p1), [#allocation10], 4294966272 }
  0x38   : > { %1295 = dma.done.wait (%p1432_p1), [#allocation13], 512  }
  0x39   : > { %1297 = vsyncadd (%p1432_p1), [#allocation13], 4294966784  ;;  %p901_p2 = scmp.ne.s32.totalorder %s1316_s20, 0 }
  0x3b   : > { %498 = sbr.rel (%p901_p2) target bundleno = 67 (0x43), region = 92 }
  0x40   : > { %vm499_vm0 = vcmask 254976   ;;  %v1333_v0 = vmov 0.0  }
  0x41   : > { %500 = vst.msk [vmem:[#allocation2] sm:$0x3] %vm499_vm0, %v1333_v0 }
  0x42   : > { %501 = vst.msk [vmem:[#allocation2 + $0x2] sm:$0x3] %vm499_vm0, %v1333_v0 }
  0x43 PF: > { %v504_v1 = vld [vmem:[#allocation6 + $0x8] sm:$0xff]  ;;  %v503_v2 = vld [vmem:[#allocation6] sm:$0xff]  ;;  %v502_v3 = vld [vmem:[%s435_s3] sm:$0x3]  ;;  %vm509_vm1 = vcmask 130048   ;;  %vm545_vm2 = vcmask 261120  }
  0x44   : > { %527 = vmatpush.msra.mxu0 %v504_v1  ;;  %v572_v4 = vld [vmem:[#allocation9 + $0x18] sm:$0xff]  ;;  %v571_v5 = vld [vmem:[#allocation9 + $0x10] sm:$0xff]  ;;  %v570_v7 = vld [vmem:[#allocation9 + $0x8] sm:$0xff]  ;;  %s1334_s12 = smov 64   ;;  %s1335_s14 = smov 96   ;;  %vm646_vm8 = vcmask 254976  }
  0x45   : > { %592 = vmatpush.msra.mxu2 %v572_v4  ;;  %v540_v6 = vld [vmem:[#allocation8 + $0x18] sm:$0xff]  ;;  %v569_v8 = vld [vmem:[#allocation9] sm:$0xff]  ;;  %v539_v10 = vld [vmem:[#allocation8 + $0x10] sm:$0xff]  ;;  %s1336_s1 = smov 32   ;;  %s1609_s27 = sld [smem:[#allocation24_spill]] }
  0x46   : > { %528 = vmatpush.msra.mxu0 %v503_v2  ;;  %561 = vmatpush.msra.mxu1 %v540_v6  ;;  %v538_v11 = vld [vmem:[#allocation8 + $0x8] sm:$0xff]  ;;  %v537_v12 = vld [vmem:[#allocation8] sm:$0xff]  ;;  %v683_v43 = vld [vmem:[#allocation12 + $0x18] sm:$0xff]  ;;  %s1610_s9 = sld [smem:[#allocation23_spill]]  ;;  %p909_p1 = scmp.ne.s32.totalorder %s1316_s20, 7 }
  0x47   : > { %902 = vmatmul.msk.f32.vlgmr.msra.gmra.mxu0 %vm509_vm1, %v502_v3  ;;  %593 = vmatpush.msra.mxu2 %v571_v5  ;;  %v1033_v13 = vld [vmem:[%s1584_s2] ss:$0 sm:$0xff]  ;;  %v682_v44 = vld [vmem:[#allocation12 + $0x10] sm:$0xff]  ;;  %v653_v45 = vld [vmem:[#allocation11 + $0x18] sm:$0xff] }
  0x48   : > { %v536_v9 = vld [vmem:[#allocation2] sm:$0x3]  ;;  %562 = vmatpush.msra.mxu1 %v539_v10  ;;  %703 = vmatpush.msrb.mxu0 %v683_v43  ;;  %v652_v47 = vld [vmem:[#allocation11 + $0x10] sm:$0xff]  ;;  %v680_v49 = vld [vmem:[#allocation12] sm:$0xff] }
  0x49   : > { %594 = vmatpush.msra.mxu2 %v570_v7  ;;  %v1034_v18 = vld [vmem:[%s1588_s6] ss:$0 sm:$0xff]  ;;  %672 = vmatpush.msra.mxu3 %v653_v45  ;;  %v649_v50 = vld [vmem:[#allocation2 + $0x2] sm:$0x3]  ;;  %v650_v51 = vld [vmem:[#allocation11] sm:$0xff] }
  0x4a   : > { %563 = vmatpush.msra.mxu1 %v538_v11  ;;  %v1035_v21 = vld [vmem:[%s1587_s5] ss:$0 sm:$0xff]  ;;  %704 = vmatpush.msrb.mxu0 %v682_v44 }
  0x4b   : > { %595 = vmatpush.msra.mxu2 %v569_v8  ;;  %v681_v46 = vld [vmem:[#allocation12 + $0x8] sm:$0xff]  ;;  %673 = vmatpush.msra.mxu3 %v652_v47 }
  0x4c   : > { %904 = vmatmul.msk.f32.vlgmr.msra.gmra.mxu2 %vm545_vm2, %v536_v9  ;;  %564 = vmatpush.msra.mxu1 %v537_v12  ;;  %v651_v48 = vld [vmem:[#allocation11 + $0x8] sm:$0xff] }
  0x4d   : > { %705 = vmatpush.msrb.mxu0 %v681_v46  ;;  %674 = vmatpush.msra.mxu3 %v651_v48  ;;  %v1036_v59 = vld [vmem:[%s1609_s27] ss:$0 sm:$0xff] }
  0x4e   : > { %v1037_v62 = vld [vmem:[%s1610_s9] ss:$0 sm:$0xff] }
  0x4f   : > { %706 = vmatpush.msrb.mxu0 %v680_v49  ;;  %675 = vmatpush.msra.mxu3 %v650_v51 }
  0x50   : > { %907 = vmatmul.msk.f32.vlgmr.msrb.gmra.mxu0 %vm545_vm2, %v649_v50 }
  0xc4   : > { %v530_v14 = vpop.f32.mrf.mxu0 }
  0xc5   : > { %v531_v15 = vadd.f32 %v1033_v13, %v530_v14 }
  0xc7   : > { %v534_v16 = vmul.f32 0.01, %v531_v15  ;;  %vm533_vm3 = vcmp.ge.f32.partialorder %v531_v15, 0.0 }
  0xc9   : > { %v535_v17 = vsel %vm533_vm3, %v531_v15, %v534_v16 }
  0xca   : > { %903 = vmatmul.msk.f32.vlgmr.msra.gmra.mxu1 %vm545_vm2, %v535_v17 }
  0xcd   : > { %v708_v60 = vpop.f32.mrf.mxu0 }
  0xce   : > { %v709_v61 = vadd.f32 %v1036_v59, %v708_v60 }
  0xcf   : > { %v597_v19 = vpop.f32.mrf.mxu2 }
  0xd0   : > { %v598_v20 = vadd.f32 %v1034_v18, %v597_v19 }
  0xd2   : > { %621 = vrot.lane.b32.xlu0 %v598_v20, %s1334_s12 }
 0x144   : > { %v622_v35 = vpop.permute.xlu0 %621 }
 0x147   : > { %v566_v22 = vpop.f32.mrf.mxu1 }
 0x148   : > { %v567_v23 = vadd.f32 %v1035_v21, %v566_v22 }
 0x14a   : > { %v600_v24 = vadd.f32 %v598_v20, %v567_v23 }
 0x14c   : > { %v905_v25 = vmul.f32 -1.442695, %v600_v24 }
 0x14e   : > { %1038 = vpow2.f32 %v905_v25 }
 0x154   : > { %v1039_v26 = vpop.eup %1038 }
 0x155   : > { %v604_v27 = vadd.f32 1.0, %v1039_v26 }
 0x157   : > { %1040 = vrcp.f32 %v604_v27  ;;  %v616_v31 = vand.u32 2147483648, %v604_v27  ;;  %v614_v33 = vand.u32 2147483647, %v604_v27  ;;  %vm610_vm5 = vweird.f32 %v604_v27 }
 0x159   : > { %v617_v36 = vor.u32 1.1754944e-38, %v616_v31  ;;  %vm615_vm7 = vcmp.eq.f32.partialorder %v614_v33, 8.507059e+37 }
 0x15d   : > { %v1041_v28 = vpop.eup %1040 }
 0x15e   : > { %v606_v29 = vmul.f32 %v1041_v28, %v604_v27  ;;  %vm611_vm4 = vweird.f32 %v1041_v28 }
 0x15f   : > { %vm612_vm6 = vmor %vm610_vm5, %vm611_vm4 }
 0x160   : > { %v607_v30 = vsub.f32 1.0, %v606_v29 }
 0x162   : > { %v608_v32 = vmul.f32 %v1041_v28, %v607_v30 }
 0x164   : > { %v609_v34 = vadd.f32 %v1041_v28, %v608_v32 }
 0x166   : > { %v613_v37 = vsel %vm612_vm6, %v1041_v28, %v609_v34 }
 0x167   : > { %v618_v38 = vsel %vm615_vm7, %v617_v36, %v613_v37 }
 0x168   : > { %v624_v39 = vmul.f32 %v622_v35, %v618_v38  ;;  %v631_v53 = vsub.f32 1.0, %v618_v38 }
 0x16a   : > { %626 = vrot.lane.b32.xlu0 %v624_v39, %s1334_s12 }
 0x1dc   : > { %v627_v40 = vpop.permute.xlu0 %626 }
 0x1dd   : > { %v629_v41 = vadd.f32 %v627_v40, %v567_v23 }
 0x1df   : > { %1042 = vtanh.f32 %v629_v41 }
 0x1e5   : > { %v1043_v42 = vpop.eup %1042 }
 0x1e6   : > { %633 = vrot.lane.b32.xlu1 %v1043_v42, %s1335_s14 }
 0x1ee   : > { %637 = vrot.lane.b32.xlu1 %v536_v9, %s1336_s1 }
 0x258   : > { %v634_v52 = vpop.permute.xlu1 %633 }
 0x259   : > { %v636_v55 = vmul.f32 %v634_v52, %v631_v53 }
 0x260   : > { %v638_v54 = vpop.permute.xlu1 %637 }
 0x261   : > { %v640_v56 = vmul.f32 %v638_v54, %v618_v38 }
 0x263   : > { %v641_v57 = vadd.f32 %v640_v56, %v636_v55 }
 0x265   : > { %643 = vrot.lane.b32.xlu2 %v641_v57, %s1335_s14 }
 0x26d   : > { %732 = vrot.lane.b32.xlu2 %v709_v61, %s1334_s12 }
 0x275   : > { %748 = vrot.lane.b32.xlu2 %v649_v50, %s1336_s1 }
 0x2bf   : > { %v644_v58 = vpop.permute.xlu2 %643 }
 0x2c0   : > { %647 = vst.msk [vmem:[#allocation2] sm:$0x3] %vm646_vm8, %v644_v58  ;;  %906 = vmatmul.msk.f32.vlgmr.msra.gmra.mxu3 %vm545_vm2, %v644_v58 }
 0x2c7   : > { %v733_v15 = vpop.permute.xlu2 %732 }
 0x2cf   : > { %v749_v20 = vpop.permute.xlu2 %748 }
 0x343   : > { %v677_v63 = vpop.f32.mrf.mxu3 }
 0x344   : > { %v678_v0 = vadd.f32 %v1037_v62, %v677_v63 }
 0x346   : > { %v711_v1 = vadd.f32 %v709_v61, %v678_v0 }
 0x348   : > { %v908_v2 = vmul.f32 -1.442695, %v711_v1 }
 0x34a   : > { %1044 = vpow2.f32 %v908_v2 }
 0x350   : > { %v1045_v3 = vpop.eup %1044 }
 0x351   : > { %v715_v4 = vadd.f32 1.0, %v1045_v3 }
 0x353   : > { %1046 = vrcp.f32 %v715_v4  ;;  %v727_v8 = vand.u32 2147483648, %v715_v4  ;;  %v725_v10 = vand.u32 2147483647, %v715_v4  ;;  %vm721_vm10 = vweird.f32 %v715_v4 }
 0x355   : > { %v728_v12 = vor.u32 1.1754944e-38, %v727_v8  ;;  %vm726_vm12 = vcmp.eq.f32.partialorder %v725_v10, 8.507059e+37 }
 0x359   : > { %v1047_v5 = vpop.eup %1046 }
 0x35a   : > { %v717_v6 = vmul.f32 %v1047_v5, %v715_v4  ;;  %vm722_vm9 = vweird.f32 %v1047_v5 }
 0x35b   : > { %vm723_vm11 = vmor %vm721_vm10, %vm722_vm9 }
 0x35c   : > { %v718_v7 = vsub.f32 1.0, %v717_v6 }
 0x35e   : > { %v719_v9 = vmul.f32 %v1047_v5, %v718_v7 }
 0x360   : > { %v720_v11 = vadd.f32 %v1047_v5, %v719_v9 }
 0x362   : > { %v724_v13 = vsel %vm723_vm11, %v1047_v5, %v720_v11 }
 0x363   : > { %v729_v14 = vsel %vm726_vm12, %v728_v12, %v724_v13 }
 0x364   : > { %v735_v16 = vmul.f32 %v733_v15, %v729_v14  ;;  %v742_v21 = vsub.f32 1.0, %v729_v14  ;;  %v751_v23 = vmul.f32 %v749_v20, %v729_v14 }
 0x366   : > { %737 = vrot.lane.b32.xlu0 %v735_v16, %s1334_s12 }
 0x3d8   : > { %v738_v17 = vpop.permute.xlu0 %737 }
 0x3d9   : > { %v740_v18 = vadd.f32 %v738_v17, %v678_v0 }
 0x3db   : > { %1048 = vtanh.f32 %v740_v18 }
 0x3e1   : > { %v1049_v19 = vpop.eup %1048 }
 0x3e2   : > { %744 = vrot.lane.b32.xlu1 %v1049_v19, %s1335_s14 }
 0x454   : > { %v745_v22 = vpop.permute.xlu1 %744 }
 0x455   : > { %v747_v24 = vmul.f32 %v745_v22, %v742_v21 }
 0x457   : > { %v752_v25 = vadd.f32 %v751_v23, %v747_v24 }
 0x459   : > { %754 = vrot.lane.b32.xlu0 %v752_v25, %s1335_s14 }
 0x4c8   : > { %761 = sbr.rel (%p909_p1) target bundleno = 1230 (0x4ce), region = 96 }
 0x4cb   : > { %v755_v26 = vpop.permute.xlu0 %754 }
 0x4cc   : > { %757 = vst.msk [vmem:[#allocation2 + $0x2] sm:$0x3] %vm646_vm8, %v755_v26 }
 0x4cd   : > { %762 = vst.msk [vmem:[#allocation14] sm:$0x3] %vm646_vm8, %v755_v26 }
 0x4ce PF: > { %s1611_s26 = sadd.s32 4294967295, %s1324_s22   ;;  %s1612_s3 = sld [smem:[#allocation25_spill]] }
 0x4cf   : > { %p971_p3 = scmp.eq.s32.totalorder %s1611_s26, 7  ;;  %s1337_s28 = smov [#allocation14]  }
 0x4d0   : > { %s771_s4 = sshll.u32 %s1337_s28, 4  ;;  %s772_s4 = int_to_ptr.vmem [resolvable:$true] %s771_s4 }
 0x4d4   : > { %s773_s24 = sshll.u32 %s1612_s3, 4  ;;  %s774_s24 = int_to_ptr.hbm [resolvable:$true] %s773_s24 }
 0x4d5   : > { %937 = dma.vmem_to_hbm [thread:$0]  (%p971_p3), %s772_s4, 32, %s774_s24, [#allocation5]  }
 0x4d6   : > { %1299 = dma.done.wait (%p971_p3), [#allocation5], 32  }
 0x4d7   : > { %1301 = vsyncadd (%p971_p3), [#allocation5], 4294967264 }
 0x4d8 PF: > { %s28_s22 = sadd.s32 1, %s1324_s22   ;;  %s1613_s17 = smov %s1308_s18 }
 0x4d9   : > { %p25_p4 = scmp.ge.s32.totalorder %s28_s22, 10   ;;  %s1614_s18 = smov %s1312_s19 }
 0x4da   : > { %s1615_s19 = smov %s1498_s13  ;;  %s1616_s20 = smov %s1320_s21 }
 0x4db   : > { %s1617_s21 = smov %s1619_s10  ;;  %27 = sbr.rel (!%p25_p4) target bundleno = 15 (0xf), region = 131 }
 0x4e0   :  { %787 = vsyncpa [#allocation4], 1 }
 0x4e1   :  { %789 = vsyncpa [#allocation4 + $0x1], 1 }
 0x4e2   :  { %790 = vsyncpa [#allocation7], 1 }
 0x4e3   :  { %791 = vsyncpa [#allocation10], 1 }
 0x4e4   :  { %792 = vsyncpa [#allocation13], 1 }
 0x4e5   :  { %793 = vsyncpa [#allocation5], 1 }
 0x4e6   :  { %795 = vsyncpa [#allocation5 + $0x1], 1 }

</bundles_post_ra>
